<compile_context>
chip_gen: v6e
topology: v6e:2x2x1
jax: 0.10.0
libtpu: 0.0.40
codegen_flags: <defaults>
</compile_context>

<pallas_src>
import math
from functools import partial

import jax
import jax.numpy as jnp
from jax import lax
from jax.experimental import pallas as pl
from jax.experimental.pallas import tpu as pltpu


def _gated_conv_kernel_factory(C, H, W, width, pad):
    C2 = 2 * C
    HW = H * W
    Hout = H + 2 * pad - width + 1
    HoutW = Hout * W
    K = width * C
    use_mxu = K >= 128  # small-C -> VPU broadcast-FMA; large-C -> fused MXU matmul

    def kernel(x_ref, w_ref, b_ref, o_ref):
        # x_ref: (1, C, H*W)       one NCHW sample, (H,W) flattened into lanes
        # w_ref: (2C, width*C)     resident, column index k = kh*C + ci
        # b_ref: (2C, 1)           resident
        # o_ref: (1, C, Hout*W)    lane-dense output block
        x = x_ref[0]                                   # (C, HW)
        wmat = w_ref[...]                              # (C2, K)
        acc = jnp.zeros((C2, HoutW), jnp.float32) + b_ref[...]

        col = lax.broadcasted_iota(jnp.int32, (C, HW), 1)

        # Build the `width` H-shifted slabs with in-kernel zero padding
        # (roll along lanes + iota mask) -- replaces the host-side jnp.pad.
        slabs = []
        for kh in range(width):
            off = (kh - pad) * W                       # shift in flattened units
            if off == 0:
                shifted = x
            else:
                shifted = pltpu.roll(x, shift=(-off) % HW, axis=1)
                valid = (col + off >= 0) & (col + off < HW)
                shifted = jnp.where(valid, shifted, 0.0)
            slabs.append(shifted if HoutW == HW else shifted[:, :HoutW])

        if use_mxu:
            # Fused im2col: a single (2C, K) @ (K, Hout*W) MXU pass.
            xcol = jnp.concatenate(slabs, axis=0)      # (K, HoutW)
            acc = acc + jnp.dot(wmat, xcol, preferred_element_type=jnp.float32)
        else:
            # VPU outer-product accumulation over the (2C, Hout*W) slab.
            for kh in range(width):                    # small static unroll
                slab = slabs[kh]
                for ci in range(C):
                    k = kh * C + ci
                    acc = acc + wmat[:, k:k + 1] * slab[ci:ci + 1, :]

        out = acc[:C, :] * jax.nn.sigmoid(acc[C:, :])  # gating, f32 epilogue
        o_ref[0] = out.astype(o_ref.dtype)

    return kernel


def gated_conv_pallas(x_nchw, weight, bias, *, width=3, nopad=False):
    """GatedConv forward.

    x_nchw : (N, C, H, W) float32
    weight : (2C, C, width, 1)  -- PyTorch Conv2d layout (OIHW)
    bias   : (2C,)
    returns: (N, C, Hout, W) where Hout = H + 2*pad - width + 1
    """
    N, C, H, W = x_nchw.shape
    C2 = 2 * C
    pad = (width // 2) * (1 - int(nopad))
    Hout = H + 2 * pad - width + 1
    HW, HoutW = H * W, Hout * W
    K = width * C

    # Free bitcast (no HBM pass, no transpose): NCHW -> (N, C, H*W).
    x_flat = x_nchw.reshape(N, C, HW)
    # Tiny weight repack (96 elems): (2C, C, width, 1) -> (2C, width*C), k = kh*C + ci.
    wmat = jnp.transpose(weight[..., 0], (0, 2, 1)).reshape(C2, K)
    b_col = bias.reshape(C2, 1).astype(jnp.float32)

    kernel = _gated_conv_kernel_factory(C, H, W, width, pad)

    out_flat = pl.pallas_call(
        kernel,
        out_shape=jax.ShapeDtypeStruct((N, C, HoutW), x_nchw.dtype),
        grid_spec=pltpu.PrefetchScalarGridSpec(
            num_scalar_prefetch=0,
            grid=(N,),
            in_specs=[
                pl.BlockSpec((1, C, HW), lambda n: (n, 0, 0)),   # per-sample slab
                pl.BlockSpec((C2, K), lambda n: (0, 0)),         # resident weights
                pl.BlockSpec((C2, 1), lambda n: (0, 0)),         # resident bias
            ],
            out_specs=pl.BlockSpec((1, C, HoutW), lambda n: (n, 0, 0)),
        ),
        compiler_params=pltpu.CompilerParams(
            dimension_semantics=("parallel",),
            vmem_limit_bytes=32 * 1024 * 1024,   # safe on v5e/v6e/v7x; blocks are small
        ),
    )(x_flat, wmat, b_col)

    # Free bitcast back to NCHW.
    return out_flat.reshape(N, C, Hout, W)


def gated_conv_reference(x_nchw, weight, bias, *, width=3, nopad=False):
    """Pure-JAX reference matching PyTorch semantics (eval-mode dropout)."""
    C = x_nchw.shape[1]
    pad = (width // 2) * (1 - int(nopad))
    y = lax.conv_general_dilated(
        x_nchw, weight,
        window_strides=(1, 1),
        padding=((pad, pad), (0, 0)),
        dimension_numbers=("NCHW", "OIHW", "NCHW"),
    ) + bias[None, :, None, None]
    out, gate = y[:, :C], y[:, C:]
    return out * jax.nn.sigmoid(gate)


def init_gated_conv_params(key, input_size, width=3, dropout=0.2):
    """Deterministic init matching the module's __init__ (xavier_uniform w/ gain)."""
    C = input_size
    out_ch = 2 * C
    fan_in = C * width * 1
    fan_out = out_ch * width * 1
    gain = (4.0 * (1.0 - dropout)) ** 0.5
    bound = gain * math.sqrt(6.0 / (fan_in + fan_out))
    k_w, k_b = jax.random.split(key)
    weight = jax.random.uniform(
        k_w, (out_ch, C, width, 1), jnp.float32, minval=-bound, maxval=bound
    )
    # PyTorch Conv2d default bias init: U(-1/sqrt(fan_in), 1/sqrt(fan_in))
    b_bound = 1.0 / math.sqrt(fan_in)
    bias = jax.random.uniform(
        k_b, (out_ch,), jnp.float32, minval=-b_bound, maxval=b_bound
    )
    return weight, bias


if __name__ == "__main__":
    # Small shapes: batch=2, channels(input_size)=4, H=16, W=16
    N, C, H, W = 2, 4, 16, 16
    width, dropout = 3, 0.2

    key = jax.random.PRNGKey(0)
    k_x, k_p = jax.random.split(key)
    x = jax.random.normal(k_x, (N, C, H, W), jnp.float32)
    weight, bias = init_gated_conv_params(k_p, C, width=width, dropout=dropout)

    fwd = jax.jit(partial(gated_conv_pallas, width=width, nopad=False))
    out = fwd(x, weight, bias)
    out = jax.block_until_ready(out)

    ref = gated_conv_reference(x, weight, bias, width=width, nopad=False)
    assert out.shape == ref.shape == (N, C, H, W), (out.shape, ref.shape)
    assert jnp.allclose(out, ref, atol=1e-5, rtol=1e-5), "mismatch vs reference"

    print("KERNEL_OK")
</pallas_src>

<mosaic_0001>
module attributes {stable_mosaic.version = 11 : i64} {
  func.func @kernel(%arg0: i32, %arg1: memref<1x4x256xf32, #tpu.memory_space<vmem>>, %arg2: memref<8x12xf32, #tpu.memory_space<vmem>>, %arg3: memref<8x1xf32, #tpu.memory_space<vmem>>, %arg4: memref<1x4x256xf32, #tpu.memory_space<vmem>>) attributes {dimension_semantics = [#tpu.dimension_semantics<parallel>], iteration_bounds = array<i64: 2>, scalar_prefetch = 0 : i64, scratch_operands = 0 : i64, tpu.core_type = #tpu.core_type<tc>, window_params = [{transform_indices = @transform_0, window_bounds = array<i64: 1, 4, 256>}, {pipeline_mode = #tpu.pipeline_mode<synchronous>, transform_indices = @transform_1, window_bounds = array<i64: 8, 12>}, {pipeline_mode = #tpu.pipeline_mode<synchronous>, transform_indices = @transform_2, window_bounds = array<i64: 8, 1>}, {transform_indices = @transform_3, window_bounds = array<i64: 1, 4, 256>}]} {
    %c0 = arith.constant 0 : index
    %c0_0 = arith.constant 0 : index
    %c0_1 = arith.constant 0 : index
    %0 = vector.load %arg1[%c0, %c0_0, %c0_1] : memref<1x4x256xf32, #tpu.memory_space<vmem>>, vector<1x4x256xf32>
    %1 = vector.shape_cast %0 : vector<1x4x256xf32> to vector<4x256xf32>
    %c0_2 = arith.constant 0 : index
    %c0_3 = arith.constant 0 : index
    %2 = vector.load %arg2[%c0_2, %c0_3] : memref<8x12xf32, #tpu.memory_space<vmem>>, vector<8x12xf32>
    %cst = arith.constant 0.000000e+00 : f32
    %3 = vector.broadcast %cst : f32 to vector<8x256xf32>
    %c0_4 = arith.constant 0 : index
    %c0_5 = arith.constant 0 : index
    %4 = vector.load %arg3[%c0_4, %c0_5] : memref<8x1xf32, #tpu.memory_space<vmem>>, vector<8x1xf32>
    %5 = vector.broadcast %4 : vector<8x1xf32> to vector<8x256xf32>
    %6 = arith.addf %3, %5 : vector<8x256xf32>
    %7 = tpu.iota {dimensions = array<i32: 1>} : vector<4x256xi32>
    %c16_i32 = arith.constant 16 : i32
    %8 = tpu.dynamic_rotate %1 by %c16_i32 dim 1 : vector<4x256xf32>, i32 -> vector<4x256xf32>
    %c-16_i32 = arith.constant -16 : i32
    %9 = vector.broadcast %c-16_i32 : i32 to vector<4x256xi32>
    %10 = arith.addi %7, %9 : vector<4x256xi32>
    %c0_i32 = arith.constant 0 : i32
    %11 = vector.broadcast %c0_i32 : i32 to vector<4x256xi32>
    %12 = arith.cmpi sge, %10, %11 : vector<4x256xi32>
    %c-16_i32_6 = arith.constant -16 : i32
    %13 = vector.broadcast %c-16_i32_6 : i32 to vector<4x256xi32>
    %14 = arith.addi %7, %13 : vector<4x256xi32>
    %c256_i32 = arith.constant 256 : i32
    %15 = vector.broadcast %c256_i32 : i32 to vector<4x256xi32>
    %16 = arith.cmpi slt, %14, %15 : vector<4x256xi32>
    %17 = arith.andi %12, %16 : vector<4x256xi1>
    %cst_7 = arith.constant 0.000000e+00 : f32
    %18 = vector.broadcast %cst_7 : f32 to vector<4x256xf32>
    %19 = arith.select %17, %8, %18 : vector<4x256xi1>, vector<4x256xf32>
    %c240_i32 = arith.constant 240 : i32
    %20 = tpu.dynamic_rotate %1 by %c240_i32 dim 1 : vector<4x256xf32>, i32 -> vector<4x256xf32>
    %c16_i32_8 = arith.constant 16 : i32
    %21 = vector.broadcast %c16_i32_8 : i32 to vector<4x256xi32>
    %22 = arith.addi %7, %21 : vector<4x256xi32>
    %c0_i32_9 = arith.constant 0 : i32
    %23 = vector.broadcast %c0_i32_9 : i32 to vector<4x256xi32>
    %24 = arith.cmpi sge, %22, %23 : vector<4x256xi32>
    %c16_i32_10 = arith.constant 16 : i32
    %25 = vector.broadcast %c16_i32_10 : i32 to vector<4x256xi32>
    %26 = arith.addi %7, %25 : vector<4x256xi32>
    %c256_i32_11 = arith.constant 256 : i32
    %27 = vector.broadcast %c256_i32_11 : i32 to vector<4x256xi32>
    %28 = arith.cmpi slt, %26, %27 : vector<4x256xi32>
    %29 = arith.andi %24, %28 : vector<4x256xi1>
    %cst_12 = arith.constant 0.000000e+00 : f32
    %30 = vector.broadcast %cst_12 : f32 to vector<4x256xf32>
    %31 = arith.select %29, %20, %30 : vector<4x256xi1>, vector<4x256xf32>
    %32 = vector.extract_strided_slice %2 {offsets = [0, 0], sizes = [8, 1], strides = [1, 1]} : vector<8x12xf32> to vector<8x1xf32>
    %33 = vector.extract_strided_slice %19 {offsets = [0, 0], sizes = [1, 256], strides = [1, 1]} : vector<4x256xf32> to vector<1x256xf32>
    %34 = vector.broadcast %32 : vector<8x1xf32> to vector<8x256xf32>
    %35 = vector.broadcast %33 : vector<1x256xf32> to vector<8x256xf32>
    %36 = arith.mulf %34, %35 : vector<8x256xf32>
    %37 = arith.addf %6, %36 : vector<8x256xf32>
    %38 = vector.extract_strided_slice %2 {offsets = [0, 1], sizes = [8, 1], strides = [1, 1]} : vector<8x12xf32> to vector<8x1xf32>
    %39 = vector.extract_strided_slice %19 {offsets = [1, 0], sizes = [1, 256], strides = [1, 1]} : vector<4x256xf32> to vector<1x256xf32>
    %40 = vector.broadcast %38 : vector<8x1xf32> to vector<8x256xf32>
    %41 = vector.broadcast %39 : vector<1x256xf32> to vector<8x256xf32>
    %42 = arith.mulf %40, %41 : vector<8x256xf32>
    %43 = arith.addf %37, %42 : vector<8x256xf32>
    %44 = vector.extract_strided_slice %2 {offsets = [0, 2], sizes = [8, 1], strides = [1, 1]} : vector<8x12xf32> to vector<8x1xf32>
    %45 = vector.extract_strided_slice %19 {offsets = [2, 0], sizes = [1, 256], strides = [1, 1]} : vector<4x256xf32> to vector<1x256xf32>
    %46 = vector.broadcast %44 : vector<8x1xf32> to vector<8x256xf32>
    %47 = vector.broadcast %45 : vector<1x256xf32> to vector<8x256xf32>
    %48 = arith.mulf %46, %47 : vector<8x256xf32>
    %49 = arith.addf %43, %48 : vector<8x256xf32>
    %50 = vector.extract_strided_slice %2 {offsets = [0, 3], sizes = [8, 1], strides = [1, 1]} : vector<8x12xf32> to vector<8x1xf32>
    %51 = vector.extract_strided_slice %19 {offsets = [3, 0], sizes = [1, 256], strides = [1, 1]} : vector<4x256xf32> to vector<1x256xf32>
    %52 = vector.broadcast %50 : vector<8x1xf32> to vector<8x256xf32>
    %53 = vector.broadcast %51 : vector<1x256xf32> to vector<8x256xf32>
    %54 = arith.mulf %52, %53 : vector<8x256xf32>
    %55 = arith.addf %49, %54 : vector<8x256xf32>
    %56 = vector.extract_strided_slice %2 {offsets = [0, 4], sizes = [8, 1], strides = [1, 1]} : vector<8x12xf32> to vector<8x1xf32>
    %57 = vector.extract_strided_slice %1 {offsets = [0, 0], sizes = [1, 256], strides = [1, 1]} : vector<4x256xf32> to vector<1x256xf32>
    %58 = vector.broadcast %56 : vector<8x1xf32> to vector<8x256xf32>
    %59 = vector.broadcast %57 : vector<1x256xf32> to vector<8x256xf32>
    %60 = arith.mulf %58, %59 : vector<8x256xf32>
    %61 = arith.addf %55, %60 : vector<8x256xf32>
    %62 = vector.extract_strided_slice %2 {offsets = [0, 5], sizes = [8, 1], strides = [1, 1]} : vector<8x12xf32> to vector<8x1xf32>
    %63 = vector.extract_strided_slice %1 {offsets = [1, 0], sizes = [1, 256], strides = [1, 1]} : vector<4x256xf32> to vector<1x256xf32>
    %64 = vector.broadcast %62 : vector<8x1xf32> to vector<8x256xf32>
    %65 = vector.broadcast %63 : vector<1x256xf32> to vector<8x256xf32>
    %66 = arith.mulf %64, %65 : vector<8x256xf32>
    %67 = arith.addf %61, %66 : vector<8x256xf32>
    %68 = vector.extract_strided_slice %2 {offsets = [0, 6], sizes = [8, 1], strides = [1, 1]} : vector<8x12xf32> to vector<8x1xf32>
    %69 = vector.extract_strided_slice %1 {offsets = [2, 0], sizes = [1, 256], strides = [1, 1]} : vector<4x256xf32> to vector<1x256xf32>
    %70 = vector.broadcast %68 : vector<8x1xf32> to vector<8x256xf32>
    %71 = vector.broadcast %69 : vector<1x256xf32> to vector<8x256xf32>
    %72 = arith.mulf %70, %71 : vector<8x256xf32>
    %73 = arith.addf %67, %72 : vector<8x256xf32>
    %74 = vector.extract_strided_slice %2 {offsets = [0, 7], sizes = [8, 1], strides = [1, 1]} : vector<8x12xf32> to vector<8x1xf32>
    %75 = vector.extract_strided_slice %1 {offsets = [3, 0], sizes = [1, 256], strides = [1, 1]} : vector<4x256xf32> to vector<1x256xf32>
    %76 = vector.broadcast %74 : vector<8x1xf32> to vector<8x256xf32>
    %77 = vector.broadcast %75 : vector<1x256xf32> to vector<8x256xf32>
    %78 = arith.mulf %76, %77 : vector<8x256xf32>
    %79 = arith.addf %73, %78 : vector<8x256xf32>
    %80 = vector.extract_strided_slice %2 {offsets = [0, 8], sizes = [8, 1], strides = [1, 1]} : vector<8x12xf32> to vector<8x1xf32>
    %81 = vector.extract_strided_slice %31 {offsets = [0, 0], sizes = [1, 256], strides = [1, 1]} : vector<4x256xf32> to vector<1x256xf32>
    %82 = vector.broadcast %80 : vector<8x1xf32> to vector<8x256xf32>
    %83 = vector.broadcast %81 : vector<1x256xf32> to vector<8x256xf32>
    %84 = arith.mulf %82, %83 : vector<8x256xf32>
    %85 = arith.addf %79, %84 : vector<8x256xf32>
    %86 = vector.extract_strided_slice %2 {offsets = [0, 9], sizes = [8, 1], strides = [1, 1]} : vector<8x12xf32> to vector<8x1xf32>
    %87 = vector.extract_strided_slice %31 {offsets = [1, 0], sizes = [1, 256], strides = [1, 1]} : vector<4x256xf32> to vector<1x256xf32>
    %88 = vector.broadcast %86 : vector<8x1xf32> to vector<8x256xf32>
    %89 = vector.broadcast %87 : vector<1x256xf32> to vector<8x256xf32>
    %90 = arith.mulf %88, %89 : vector<8x256xf32>
    %91 = arith.addf %85, %90 : vector<8x256xf32>
    %92 = vector.extract_strided_slice %2 {offsets = [0, 10], sizes = [8, 1], strides = [1, 1]} : vector<8x12xf32> to vector<8x1xf32>
    %93 = vector.extract_strided_slice %31 {offsets = [2, 0], sizes = [1, 256], strides = [1, 1]} : vector<4x256xf32> to vector<1x256xf32>
    %94 = vector.broadcast %92 : vector<8x1xf32> to vector<8x256xf32>
    %95 = vector.broadcast %93 : vector<1x256xf32> to vector<8x256xf32>
    %96 = arith.mulf %94, %95 : vector<8x256xf32>
    %97 = arith.addf %91, %96 : vector<8x256xf32>
    %98 = vector.extract_strided_slice %2 {offsets = [0, 11], sizes = [8, 1], strides = [1, 1]} : vector<8x12xf32> to vector<8x1xf32>
    %99 = vector.extract_strided_slice %31 {offsets = [3, 0], sizes = [1, 256], strides = [1, 1]} : vector<4x256xf32> to vector<1x256xf32>
    %100 = vector.broadcast %98 : vector<8x1xf32> to vector<8x256xf32>
    %101 = vector.broadcast %99 : vector<1x256xf32> to vector<8x256xf32>
    %102 = arith.mulf %100, %101 : vector<8x256xf32>
    %103 = arith.addf %97, %102 : vector<8x256xf32>
    %104 = vector.extract_strided_slice %103 {offsets = [0, 0], sizes = [4, 256], strides = [1, 1]} : vector<8x256xf32> to vector<4x256xf32>
    %105 = vector.extract_strided_slice %103 {offsets = [4, 0], sizes = [4, 256], strides = [1, 1]} : vector<8x256xf32> to vector<4x256xf32>
    %106 = arith.negf %105 : vector<4x256xf32>
    %107 = math.exp %106 : vector<4x256xf32>
    %cst_13 = arith.constant 1.000000e+00 : f32
    %108 = vector.broadcast %cst_13 : f32 to vector<4x256xf32>
    %109 = arith.addf %108, %107 : vector<4x256xf32>
    %110 = arith.divf %108, %109 : vector<4x256xf32>
    %111 = arith.mulf %104, %110 : vector<4x256xf32>
    %c0_14 = arith.constant 0 : index
    %c0_15 = arith.constant 0 : index
    %c0_16 = arith.constant 0 : index
    %112 = vector.load %arg4[%c0_14, %c0_15, %c0_16] : memref<1x4x256xf32, #tpu.memory_space<vmem>>, vector<1x4x256xf32>
    %113 = vector.shape_cast %112 : vector<1x4x256xf32> to vector<4x256xf32>
    %114 = vector.shape_cast %111 : vector<4x256xf32> to vector<1x4x256xf32>
    tpu.vector_store %arg4[%c0_14, %c0_15, %c0_16], %114 {strides = array<i32>} : memref<1x4x256xf32, #tpu.memory_space<vmem>>, vector<1x4x256xf32>,
    return
  }
  func.func @transform_0(%arg0: i32) -> (i32, i32, i32) {
    %c0_i32 = arith.constant 0 : i32
    %c0_i32_0 = arith.constant 0 : i32
    %c0_i32_1 = arith.constant 0 : i32
    return %arg0, %c0_i32, %c0_i32_0 : i32, i32, i32
  }
  func.func @transform_1(%arg0: i32) -> (i32, i32) {
    %c0_i32 = arith.constant 0 : i32
    %c0_i32_0 = arith.constant 0 : i32
    %c0_i32_1 = arith.constant 0 : i32
    return %c0_i32, %c0_i32_0 : i32, i32
  }
  func.func @transform_2(%arg0: i32) -> (i32, i32) {
    %c0_i32 = arith.constant 0 : i32
    %c0_i32_0 = arith.constant 0 : i32
    %c0_i32_1 = arith.constant 0 : i32
    return %c0_i32, %c0_i32_0 : i32, i32
  }
  func.func @transform_3(%arg0: i32) -> (i32, i32, i32) {
    %c0_i32 = arith.constant 0 : i32
    %c0_i32_0 = arith.constant 0 : i32
    %c0_i32_1 = arith.constant 0 : i32
    return %arg0, %c0_i32, %c0_i32_0 : i32, i32, i32
  }
}

</mosaic_0001>

<bundles_post_ra>
// kernel: gated_conv_pallas.1
= control target key start
LH: loop header
LB: loop body
LE: loop exit
PB: predicated region body
PF: predicated region fallthrough
CT: control target
= control target key end

     0   :  { %s635_s12 = smov 0   ;;  %s731_s0 = inlined_call_operand.vmem [shape: f32[2,4,256], index: 0, kind: input, shape index: {}]   ;;  %s732_s1 = inlined_call_operand.vmem [shape: f32[8,12], index: 1, kind: input, shape index: {}]   ;;  %s733_s2 = inlined_call_operand.vmem [shape: f32[8,1], index: 2, kind: input, shape index: {}]   ;;  %s734_s3 = inlined_call_operand.vmem [shape: f32[2,4,256], index: 3, kind: output, shape index: {}]  }
   0x1 LB: > { %s533_s13 = sadd.s32 4294967295, %s599_s12   ;;  %p537_p0 = scmp.ge.s32.totalorder %s599_s12, 1  ;;  %s599_s12 = sphi %s635_s12, %s13_s12  }
   0x2   : > { %p137_p1 = scmp.lt.s32.totalorder %s599_s12, 3 }
   0x4   : > { %p138_p2 = pnand %p537_p0, %p137_p1 }
   0x5   : > { %p161_p3 = scmp.lt.s32.totalorder (!%p138_p2), %s533_s13, 1  ;;  %s604_s22 = smov (!%p138_p2), 16  }
   0x6   : > { %141 = sbr.rel (%p138_p2) target bundleno = 222 (0xde), region = 32  ;;  %s610_s23 = smov (!%p138_p2), 112  }
   0xb   : > { %v173_v0 = vld [vmem:[%s733_s2] sm:$0xff]  ;;  %v601_v2 = vmov 0   ;;  %s736_s13 = smov (!%p161_p3, %s533_s13), 1  ;;  %v602_v3 = vmov 2   ;;  %v603_v5 = vmov 1   ;;  %v605_v7 = vmov 3  }
   0xc   : > { %v172_v1 = vld [vmem:[%s732_s1] sm:$0xff]  ;;  %571 = vset.pattern.permute.xlu1 %v601_v2  ;;  %570 = vset.pattern.permute.xlu0 %v601_v2  ;;  %s546_s18 = sshll.u32 %s736_s13, 3  ;;  %v606_v8 = vmov 4   ;;  %v607_v9 = vmov 5   ;;  %v608_v10 = vmov 7   ;;  %v609_v11 = vmov 6  }
   0xd   : > { %176 = vperm.xlu1 %571, %v173_v0   ;;  %222 = vperm.xlu0 %570, %v172_v1   ;;  %s165_s21 = scalar_lea.vmem %s731_s0, %s546_s18  ;;  %v611_v12 = vmov 10   ;;  %v612_v13 = vmov 8   ;;  %v613_v14 = vmov 11   ;;  %v614_v15 = vmov 9   ;;  %s170_s26 = scalar_lea.vmem %s734_s3, %s546_s18 }
   0xe   : > { %v657_v4 = vld [vmem:[%s165_s21] sm:$0xff]  ;;  %v180_v16 = vlaneseq }
   0xf   : > { %v184_v6 = vcombine.high %v657_v4, %v657_v4 }
  0x10   : > { %v663_v18 = vand.u32 127, %v180_v16  ;;  %v665_v20 = vshrl.u32 %v180_v16, 7 }
  0x11   : > { %573 = vset.pattern.permute.xlu1 %v602_v3  ;;  %572 = vset.pattern.permute.xlu0 %v603_v5 }
  0x12   : > { %254 = vperm.xlu1 %573, %v172_v1   ;;  %186 = vrot.lane.b32.xlu0 %v657_v4, %s604_s22  ;;  %v193_v21 = vadd.s32 4294967280, %v663_v18  ;;  %vm190_vm0 = vcmp.lt.s32.totalorder %v663_v18, 16  ;;  %v670_v23 = vsub.s32 0, %v665_v20  ;;  %v673_v24 = vsub.s32 1, %v665_v20 }
  0x13   : > { %v676_v26 = vsub.s32 2, %v665_v20  ;;  %v295_v28 = vsub.s32 4, %v665_v20  ;;  %v682_v34 = vsub.s32 3, %v665_v20  ;;  %v321_v48 = vsub.s32 5, %v665_v20 }
  0x14   : > { %vm195_vm1 = vcmp.ge.s32.totalorder %v193_v21, 0  ;;  %v292_v38 = vrot.slane %v657_v4, %v670_v23  ;;  %v347_v56 = vsub.s32 6, %v665_v20  ;;  %v318_v59 = vrot.slane %v657_v4, %v673_v24 }
  0x15   : > { %v296_v42 = vrot.slane %v657_v4, %v295_v28  ;;  %v322_v0 = vrot.slane %v657_v4, %v321_v48  ;;  %v370_v16 = vrot.slane %v657_v4, %v682_v34  ;;  %vm207_vm2 = vcmp.lt.s32.totalorder %v663_v18, 112 }
  0x16   : > { %188 = vrot.lane.b32.xlu1 %v184_v6, %s604_s22  ;;  %238 = vperm.xlu0 %572, %v172_v1   ;;  %v302_v52 = vrot.slane %v292_v38, %v670_v23 }
  0x17   : > { %574 = vset.pattern.permute.xlu1 %v605_v7  ;;  %v306_v55 = vrot.slane %v296_v42, %v670_v23  ;;  %v373_v7 = vsub.s32 7, %v665_v20 }
  0x1a   : > { %270 = vperm.xlu1 %574, %v172_v1   ;;  %575 = vset.pattern.permute.xlu0 %v606_v8  ;;  %v348_v8 = vrot.slane %v657_v4, %v347_v56 }
  0x1b   : > { %286 = vperm.xlu0 %575, %v172_v1  }
  0x1c   : > { %v358_v20 = vrot.slane %v348_v8, %v676_v26 }
  0x1e   : > { %576 = vset.pattern.permute.xlu1 %v607_v9 }
  0x1f   : > { %312 = vperm.xlu1 %576, %v172_v1   ;;  %578 = vset.pattern.permute.xlu0 %v608_v10  ;;  %v328_v10 = vrot.slane %v318_v59, %v673_v24 }
  0x20   : > { %364 = vperm.xlu0 %578, %v172_v1  }
  0x23   : > { %577 = vset.pattern.permute.xlu1 %v609_v11  ;;  %v344_v11 = vrot.slane %v657_v4, %v676_v26 }
  0x24   : > { %338 = vperm.xlu1 %577, %v172_v1   ;;  %205 = vrot.lane.b32.xlu0 %v184_v6, %s610_s23 }
  0x25   : > { %581 = vset.pattern.permute.xlu0 %v611_v12  ;;  %v332_v12 = vrot.slane %v322_v0, %v673_v24 }
  0x28   : > { %579 = vset.pattern.permute.xlu1 %v612_v13  ;;  %422 = vperm.xlu0 %581, %v172_v1  }
  0x29   : > { %390 = vperm.xlu1 %579, %v172_v1  }
  0x2c   : > { %583 = vset.pattern.permute.xlu0 %v613_v14 }
  0x2d   : > { %203 = vrot.lane.b32.xlu1 %v657_v4, %s610_s23 }
  0x2e   : > { %580 = vset.pattern.permute.xlu1 %v614_v15 }
  0x31   : > { %406 = vperm.xlu1 %580, %v172_v1  }
  0x35   : > { %582 = vset.pattern.permute.xlu1 %v613_v14  ;;  %v182_v14 = vadd.s32 128, %v663_v18 }
  0x36   : > { %438 = vperm.xlu1 %582, %v172_v1  }
  0x37   : > { %v211_v28 = vadd.s32 16, %v182_v14 }
  0x39   : > { %vm215_vm3 = vcmp.lt.s32.totalorder %v211_v28, 256 }
  0x88   : > { %v177_v17 = vpop.permute.xlu1 %176  ;;  %v223_v19 = vpop.permute.xlu0 %222 }
  0x8c   : > { %v187_v25 = vpop.permute.xlu0 %186 }
  0x8d   : > { %v255_v22 = vpop.permute.xlu1 %254 }
  0x91   : > { %v189_v27 = vpop.permute.xlu1 %188  ;;  %v239_v36 = vpop.permute.xlu0 %238 }
  0x92   : > { %v191_v29 = vsel %vm190_vm0, %v187_v25, %v189_v27  ;;  %v192_v30 = vsel %vm190_vm0, %v189_v27, %v187_v25  ;;  %v354_v25 = vrot.slane %v344_v11, %v676_v26 }
  0x93   : > { %v201_v31 = vsel %vm195_vm1, %v192_v30, 0.0  ;;  %v232_v32 = vrot.slane %v191_v29, %v670_v23  ;;  %v248_v33 = vrot.slane %v191_v29, %v673_v24  ;;  %v264_v39 = vrot.slane %v191_v29, %v676_v26 }
  0x94   : > { %v228_v35 = vrot.slane %v201_v31, %v670_v23  ;;  %v244_v37 = vrot.slane %v201_v31, %v673_v24  ;;  %v260_v43 = vrot.slane %v201_v31, %v676_v26  ;;  %v280_v47 = vrot.slane %v191_v29, %v682_v34 }
  0x95   : > { %v234_v40 = vmul.f32 %v232_v32, %v223_v19  ;;  %v271_v41 = vpop.permute.xlu1 %270  ;;  %v250_v46 = vmul.f32 %v248_v33, %v239_v36  ;;  %v276_v51 = vrot.slane %v201_v31, %v682_v34  ;;  %v266_v54 = vmul.f32 %v264_v39, %v255_v22 }
  0x96   : > { %v233_v44 = vmul.f32 %v228_v35, %v223_v19  ;;  %v249_v50 = vmul.f32 %v244_v37, %v239_v36  ;;  %v265_v58 = vmul.f32 %v260_v43, %v255_v22  ;;  %v287_v61 = vpop.permute.xlu0 %286  ;;  %v282_v63 = vmul.f32 %v280_v47, %v271_v41 }
  0x97   : > { %v236_v45 = vadd.f32 %v234_v40, %v177_v17  ;;  %v281_v2 = vmul.f32 %v276_v51, %v271_v41  ;;  %v307_v3 = vmul.f32 %v302_v52, %v287_v61  ;;  %v308_v6 = vmul.f32 %v306_v55, %v287_v61 }
  0x98   : > { %v235_v49 = vadd.f32 %v233_v44, %v177_v17  ;;  %v374_v19 = vrot.slane %v657_v4, %v373_v7  ;;  %v380_v29 = vrot.slane %v370_v16, %v682_v34 }
  0x99   : > { %v252_v53 = vadd.f32 %v250_v46, %v236_v45 }
  0x9a   : > { %v251_v57 = vadd.f32 %v249_v50, %v235_v49  ;;  %v313_v60 = vpop.permute.xlu1 %312  ;;  %v384_v32 = vrot.slane %v374_v19, %v682_v34 }
  0x9b   : > { %v268_v62 = vadd.f32 %v266_v54, %v252_v53  ;;  %v333_v21 = vmul.f32 %v328_v10, %v313_v60  ;;  %v365_v22 = vpop.permute.xlu0 %364  ;;  %v334_v27 = vmul.f32 %v332_v12, %v313_v60 }
  0x9c   : > { %v267_v1 = vadd.f32 %v265_v58, %v251_v57  ;;  %v385_v4 = vmul.f32 %v380_v29, %v365_v22  ;;  %v386_v40 = vmul.f32 %v384_v32, %v365_v22 }
  0x9d   : > { %v284_v5 = vadd.f32 %v282_v63, %v268_v62 }
  0x9e   : > { %v283_v9 = vadd.f32 %v281_v2, %v267_v1 }
  0x9f   : > { %v339_v13 = vpop.permute.xlu1 %338  ;;  %v310_v17 = vadd.f32 %v308_v6, %v284_v5  ;;  %v206_v38 = vpop.permute.xlu0 %205 }
  0xa0   : > { %v309_v15 = vadd.f32 %v307_v3, %v283_v9  ;;  %v360_v35 = vmul.f32 %v358_v20, %v339_v13  ;;  %v359_v36 = vmul.f32 %v354_v25, %v339_v13 }
  0xa1   : > { %v336_v33 = vadd.f32 %v334_v27, %v310_v17 }
  0xa2   : > { %v335_v30 = vadd.f32 %v333_v21, %v309_v15 }
  0xa3   : > { %v362_v41 = vadd.f32 %v360_v35, %v336_v33  ;;  %v423_v53 = vpop.permute.xlu0 %422 }
  0xa4   : > { %v391_v31 = vpop.permute.xlu1 %390  ;;  %v361_v37 = vadd.f32 %v359_v36, %v335_v30 }
  0xa5   : > { %v388_v52 = vadd.f32 %v386_v40, %v362_v41 }
  0xa6   : > { %v387_v49 = vadd.f32 %v385_v4, %v361_v37 }
  0xa8   : > { %v204_v39 = vpop.permute.xlu1 %203 }
  0xa9   : > { %v208_v42 = vsel %vm207_vm2, %v204_v39, %v206_v38  ;;  %v209_v43 = vsel %vm207_vm2, %v206_v38, %v204_v39 }
  0xaa   : > { %v219_v44 = vsel %vm215_vm3, %v209_v43, 0.0  ;;  %v396_v45 = vrot.slane %v208_v42, %v670_v23  ;;  %v412_v46 = vrot.slane %v208_v42, %v673_v24  ;;  %v428_v18 = vrot.slane %v208_v42, %v676_v26 }
  0xab   : > { %v400_v47 = vrot.slane %v219_v44, %v670_v23  ;;  %v416_v48 = vrot.slane %v219_v44, %v673_v24  ;;  %v432_v54 = vrot.slane %v219_v44, %v676_v26  ;;  %v444_v23 = vrot.slane %v208_v42, %v682_v34 }
  0xac   : > { %v401_v50 = vmul.f32 %v396_v45, %v391_v31  ;;  %v407_v51 = vpop.permute.xlu1 %406  ;;  %v433_v60 = vmul.f32 %v428_v18, %v423_v53  ;;  %v448_v24 = vrot.slane %v219_v44, %v682_v34 }
  0xad   : > { %v402_v55 = vmul.f32 %v400_v47, %v391_v31  ;;  %v417_v56 = vmul.f32 %v412_v46, %v407_v51  ;;  %v418_v59 = vmul.f32 %v416_v48, %v407_v51  ;;  %v434_v62 = vmul.f32 %v432_v54, %v423_v53 }
  0xae   : > { %v403_v57 = vadd.f32 %v401_v50, %v387_v49 }
  0xaf   : > { %v404_v58 = vadd.f32 %v402_v55, %v388_v52 }
  0xb0   : > { %v419_v61 = vadd.f32 %v417_v56, %v403_v57 }
  0xb1   : > { %v420_v63 = vadd.f32 %v418_v59, %v404_v58  ;;  %v439_v0 = vpop.permute.xlu1 %438 }
  0xb2   : > { %v435_v1 = vadd.f32 %v433_v60, %v419_v61  ;;  %v449_v2 = vmul.f32 %v444_v23, %v439_v0  ;;  %v450_v3 = vmul.f32 %v448_v24, %v439_v0 }
  0xb3   : > { %v436_v5 = vadd.f32 %v434_v62, %v420_v63 }
  0xb4   : > { %v451_v6 = vadd.f32 %v449_v2, %v435_v1 }
  0xb5   : > { %v452_v26 = vadd.f32 %v450_v3, %v436_v5 }
  0xb6   : > { %v542_v7 = vmul.f32 -1.442695, %v451_v6 }
  0xb7   : > { %v543_v8 = vmul.f32 -1.442695, %v452_v26 }
  0xb8   : > { %585 = vpow2.f32 %v542_v7 }
  0xb9   : > { %587 = vpow2.f32 %v543_v8 }
  0xc5   : > { %v586_v9 = vpop.eup %585 }
  0xc6   : > { %v588_v10 = vpop.eup %587  ;;  %v459_v11 = vadd.f32 1.0, %v586_v9 }
  0xc7   : > { %v460_v12 = vadd.f32 1.0, %v588_v10 }
  0xc8   : > { %589 = vrcp.f32 %v459_v11 }
  0xc9   : > { %591 = vrcp.f32 %v460_v12 }
  0xd5   : > { %v590_v34 = vpop.eup %589 }
  0xd6   : > { %v592_v13 = vpop.eup %591  ;;  %v467_v14 = vrot.slane %v590_v34, 4 }
  0xd7   : > { %v468_v15 = vrot.slane %v592_v13, 4 }
  0xd8   : > { %v471_v16 = vmul.f32 %v467_v14, %v451_v6 }
  0xd9   : > { %v472_v17 = vmul.f32 %v468_v15, %v452_v26 }
  0xdb   : > { %v475_v19 = vcombine.low %v471_v16, %v472_v17 }
  0xdd   : > { %477 = vst [vmem:[%s170_s26] sm:$0xff] %v475_v19 }
  0xde PF: > { %s13_s12 = sadd.s32 1, %s599_s12  }
  0xdf   : > { %p10_p4 = scmp.ge.s32.totalorder %s13_s12, 4  }
  0xe1   :  { %12 = sbr.rel (!%p10_p4) target bundleno = 1 (0x1), region = 62 }

</bundles_post_ra>
